<compile_context>
chip_gen: v7x
topology: tpu7x:2x2x1
jax: 0.10.0
libtpu: 0.0.40
codegen_flags: <defaults>
</compile_context>

<pallas_src>
import math
from functools import partial

import jax
import jax.numpy as jnp
from jax import lax
from jax.experimental import pallas as pl
from jax.experimental.pallas import tpu as pltpu


# ----------------------------- in-kernel helpers -----------------------------

def _layernorm(h, g, b, eps=1e-5):
    mu = jnp.mean(h, axis=-1, keepdims=True)
    var = jnp.mean((h - mu) ** 2, axis=-1, keepdims=True)
    return (h - mu) * lax.rsqrt(var + eps) * g + b


def _softmax_last(s):
    s = s - jnp.max(s, axis=-1, keepdims=True)
    p = jnp.exp(s)
    # EUP approx reciprocal instead of a multi-op VPU divide for the softmax denominator.
    return p * pl.reciprocal(jnp.sum(p, axis=-1, keepdims=True), approx=True)


# ------------------------------- Pallas kernel --------------------------------

def conformer_attn_kernel(x_ref, pe_ref,
                          g1_ref, b1_ref, g2_ref, b2_ref,
                          wqkv1_ref, bqkv1_ref, wo1_ref, bo1_ref,
                          wqkv2_ref, bqkv2_ref, wo2_ref, bo2_ref,
                          out_ref):
    xb = x_ref[...]                       # (Bt, L, D)
    Bt, L, D = xb.shape
    pe = pe_ref[...][None]                # (1, L, D) broadcasts over the batch block

    # ---- block 1: token self-attention (sequence axis = L, embed dim = D) ----
    h1 = _layernorm(xb, g1_ref[...], b1_ref[...]) + pe                  # (Bt, L, D)
    # Fused QKV projection as ONE (Bt*L, D) x (D, 3D) matmul; 1/sqrt(D) is folded into wq/bq
    # wrapper-side so no (L, L) score scaling is needed in-kernel.
    qkv1 = (jnp.dot(h1.reshape(Bt * L, D), wqkv1_ref[...],
                    preferred_element_type=jnp.float32)
            + bqkv1_ref[...]).reshape(Bt, L, 3 * D)
    q1 = qkv1[:, :, 0:D]
    k1 = qkv1[:, :, D:2 * D]
    v1 = qkv1[:, :, 2 * D:3 * D]
    # Batched "NT" einsum: MXU consumes the transposed operand, no explicit k.T materialized.
    p1 = _softmax_last(jnp.einsum('bqd,bkd->bqk', q1, k1,
                                  preferred_element_type=jnp.float32))  # (Bt, L, L)
    ctx1 = jnp.einsum('bqk,bkd->bqd', p1, v1,
                      preferred_element_type=jnp.float32)               # (Bt, L, D)
    attn1 = (jnp.dot(ctx1.reshape(Bt * L, D), wo1_ref[...],
                     preferred_element_type=jnp.float32)
             + bo1_ref[...]).reshape(Bt, L, D)
    x1 = xb + attn1                                                     # dropout_1 == identity (eval)

    # ---- block 2: embedding self-attention (sequence axis = D, embed dim = L) ----
    h2 = _layernorm(x1, g2_ref[...], b2_ref[...]) + pe                  # (Bt, L, D)
    h2t = jnp.swapaxes(h2, 1, 2)                                        # (Bt, D, L)  (= permute(0,2,1))
    qkv2 = (jnp.dot(h2t.reshape(Bt * D, L), wqkv2_ref[...],
                    preferred_element_type=jnp.float32)
            + bqkv2_ref[...]).reshape(Bt, D, 3 * L)
    q2 = qkv2[:, :, 0:L]
    k2 = qkv2[:, :, L:2 * L]
    v2 = qkv2[:, :, 2 * L:3 * L]
    p2 = _softmax_last(jnp.einsum('bdm,bem->bde', q2, k2,
                                  preferred_element_type=jnp.float32))  # (Bt, D, D)
    ctx2 = jnp.einsum('bde,bel->bdl', p2, v2,
                      preferred_element_type=jnp.float32)               # (Bt, D, L)
    attn2 = (jnp.dot(ctx2.reshape(Bt * D, L), wo2_ref[...],
                     preferred_element_type=jnp.float32)
             + bo2_ref[...]).reshape(Bt, D, L)
    # dropout_2 == identity (eval); single permute back to (Bt, L, D)
    out_ref[...] = x1 + jnp.swapaxes(attn2, 1, 2)


# ------------------------------ wrapper --------------------------------------

def _const_spec(a):
    n = a.ndim
    return pl.BlockSpec(a.shape, lambda i, _n=n: (0,) * _n)


@partial(jax.jit, static_argnames=("block_b",))
def conformer_attention(x, params, pe, *, block_b=None):
    """x: (B, L, D) float32. params: dict of (unfused) weights. pe: (L, D) positional table."""
    B, L, D = x.shape
    if block_b is None:
        # Batch several batch elements per grid step so the fused projections have
        # M = block_b*L rows (target ~256) instead of L rows; amortizes the per-step
        # pipeline overhead and fills MXU rows.  On v7x you may cap block_b so the grid
        # keeps >= 2 steps and both TensorCores get work.
        target = max(1, 256 // L)
        block_b = max(d for d in range(1, B + 1) if B % d == 0 and d <= target)
    assert B % block_b == 0

    # Fold the 1/sqrt(embed_dim) attention scale into the Q projection and fuse Q/K/V into
    # one (E, 3E) matmul per attention block (one MXU push/drain instead of three).
    s1 = 1.0 / math.sqrt(D)
    s2 = 1.0 / math.sqrt(L)
    wqkv1 = jnp.concatenate([params["wq1"] * s1, params["wk1"], params["wv1"]], axis=1)  # (D, 3D)
    bqkv1 = jnp.concatenate([params["bq1"] * s1, params["bk1"], params["bv1"]], axis=1)  # (1, 3D)
    wqkv2 = jnp.concatenate([params["wq2"] * s2, params["wk2"], params["wv2"]], axis=1)  # (L, 3L)
    bqkv2 = jnp.concatenate([params["bq2"] * s2, params["bk2"], params["bv2"]], axis=1)  # (1, 3L)

    consts = [pe,
              params["g1"], params["b1"], params["g2"], params["b2"],
              wqkv1, bqkv1, params["wo1"], params["bo1"],
              wqkv2, bqkv2, params["wo2"], params["bo2"]]

    in_specs = [pl.BlockSpec((block_b, L, D), lambda i: (i, 0, 0))]
    in_specs += [_const_spec(a) for a in consts]     # constant index maps -> DMA'd once, revisited

    # TODO(synk): key_padding_mask support is omitted (forward is called with mask=None).
    # TODO(synk): for production shapes, feed bf16 operands to the matmuls (f32 accumulate)
    #             on v6e/v7x and make D a multiple of 128 for lane-dense stores; kept f32
    #             here so the demo-shape correctness check stays tight.
    return pl.pallas_call(
        conformer_attn_kernel,
        out_shape=jax.ShapeDtypeStruct((B, L, D), x.dtype),
        grid_spec=pltpu.PrefetchScalarGridSpec(
            num_scalar_prefetch=0,
            grid=(B // block_b,),
            in_specs=in_specs,
            out_specs=pl.BlockSpec((block_b, L, D), lambda i: (i, 0, 0)),
        ),
        # out = x + ... with disjoint per-step blocks -> alias x to the output buffer.
        input_output_aliases={0: 0},
        compiler_params=pltpu.CompilerParams(
            dimension_semantics=("parallel",),
        ),
    )(x, *consts)


# ---------------------------- pure-JAX reference ------------------------------

def reference(x, params, pe):
    def ln(h, g, b):
        mu = jnp.mean(h, axis=-1, keepdims=True)
        var = jnp.mean((h - mu) ** 2, axis=-1, keepdims=True)
        return (h - mu) / jnp.sqrt(var + 1e-5) * g + b

    def attn(h, wq, bq, wk, bk, wv, bv, wo, bo, scale):
        q = h @ wq + bq
        k = h @ wk + bk
        v = h @ wv + bv
        s = (q @ k.T) * scale
        p = jax.nn.softmax(s, axis=-1)
        return (p @ v) @ wo + bo

    def per_batch(xb):
        L, D = xb.shape
        h1 = ln(xb, params["g1"], params["b1"]) + pe
        x1 = xb + attn(h1, params["wq1"], params["bq1"], params["wk1"], params["bk1"],
                       params["wv1"], params["bv1"], params["wo1"], params["bo1"],
                       1.0 / math.sqrt(D))
        h2 = ln(x1, params["g2"], params["b2"]) + pe
        o2 = attn(h2.T, params["wq2"], params["bq2"], params["wk2"], params["bk2"],
                  params["wv2"], params["bv2"], params["wo2"], params["bo2"],
                  1.0 / math.sqrt(L))
        return x1 + o2.T

    return jax.vmap(per_batch)(x)


# ------------------------------ parameter init --------------------------------

def make_position_encoding(L, D):
    # standard sinusoidal PE (PositionEncoding(input_dim, max_len=1000), truncated to L)
    pos = jnp.arange(L, dtype=jnp.float32)[:, None]
    div = jnp.exp(jnp.arange(0, D, 2, dtype=jnp.float32) * (-math.log(10000.0) / D))
    pe = jnp.zeros((L, D), dtype=jnp.float32)
    pe = pe.at[:, 0::2].set(jnp.sin(pos * div))
    pe = pe.at[:, 1::2].set(jnp.cos(pos * div))
    return pe


def make_params(key, L, D):
    ks = jax.random.split(key, 16)
    p = {}
    # LayerNorm params (PyTorch init: gamma=1, beta=0)
    p["g1"] = jnp.ones((1, D), jnp.float32)
    p["b1"] = jnp.zeros((1, D), jnp.float32)
    p["g2"] = jnp.ones((1, D), jnp.float32)
    p["b2"] = jnp.zeros((1, D), jnp.float32)
    # token self-attention: embed_dim = D
    for i, name in enumerate(["wq1", "wk1", "wv1", "wo1"]):
        p[name] = 0.1 * jax.random.normal(ks[i], (D, D), jnp.float32)
    for i, name in enumerate(["bq1", "bk1", "bv1", "bo1"]):
        p[name] = 0.01 * jax.random.normal(ks[4 + i], (1, D), jnp.float32)
    # embedding self-attention: embed_dim = L
    for i, name in enumerate(["wq2", "wk2", "wv2", "wo2"]):
        p[name] = 0.1 * jax.random.normal(ks[8 + i], (L, L), jnp.float32)
    for i, name in enumerate(["bq2", "bk2", "bv2", "bo2"]):
        p[name] = 0.01 * jax.random.normal(ks[12 + i], (1, L), jnp.float32)
    return p


# ---------------------------------- main --------------------------------------

if __name__ == "__main__":
    B, L, D = 2, 16, 32          # batch, input_length, input_dim
    key = jax.random.PRNGKey(0)
    kx, kp = jax.random.split(key)

    x = jax.random.normal(kx, (B, L, D), jnp.float32)
    params = make_params(kp, L, D)
    pe = make_position_encoding(L, D)

    # Reference first (the kernel may alias/consume x's buffer via input_output_aliases).
    ref = jax.block_until_ready(reference(x, params, pe))

    out = conformer_attention(x, params, pe)
    out = jax.block_until_ready(out)

    assert out.shape == (B, L, D)
    max_err = float(jnp.max(jnp.abs(out - ref)))
    # tolerance loosened slightly vs pure-f32 because of pl.reciprocal(approx=True) in softmax
    assert jnp.allclose(out, ref, atol=5e-3, rtol=5e-3), max_err
    print("KERNEL_OK")
</pallas_src>

<mosaic_0001>
module attributes {stable_mosaic.version = 11 : i64} {
  func.func @conformer_attn_kernel(%arg0: i32, %arg1: memref<2x16x32xf32, #tpu.memory_space<vmem>>, %arg2: memref<16x32xf32, #tpu.memory_space<vmem>>, %arg3: memref<1x32xf32, #tpu.memory_space<vmem>>, %arg4: memref<1x32xf32, #tpu.memory_space<vmem>>, %arg5: memref<1x32xf32, #tpu.memory_space<vmem>>, %arg6: memref<1x32xf32, #tpu.memory_space<vmem>>, %arg7: memref<32x96xf32, #tpu.memory_space<vmem>>, %arg8: memref<1x96xf32, #tpu.memory_space<vmem>>, %arg9: memref<32x32xf32, #tpu.memory_space<vmem>>, %arg10: memref<1x32xf32, #tpu.memory_space<vmem>>, %arg11: memref<16x48xf32, #tpu.memory_space<vmem>>, %arg12: memref<1x48xf32, #tpu.memory_space<vmem>>, %arg13: memref<16x16xf32, #tpu.memory_space<vmem>>, %arg14: memref<1x16xf32, #tpu.memory_space<vmem>>, %arg15: memref<2x16x32xf32, #tpu.memory_space<vmem>>) attributes {dimension_semantics = [#tpu.dimension_semantics<parallel>], iteration_bounds = array<i64: 1>, scalar_prefetch = 0 : i64, scratch_operands = 0 : i64, tpu.core_type = #tpu.core_type<tc>, window_params = [{transform_indices = @transform_0, window_bounds = array<i64: 2, 16, 32>}, {pipeline_mode = #tpu.pipeline_mode<synchronous>, transform_indices = @transform_1, window_bounds = array<i64: 16, 32>}, {pipeline_mode = #tpu.pipeline_mode<synchronous>, transform_indices = @transform_2, window_bounds = array<i64: 1, 32>}, {pipeline_mode = #tpu.pipeline_mode<synchronous>, transform_indices = @transform_3, window_bounds = array<i64: 1, 32>}, {pipeline_mode = #tpu.pipeline_mode<synchronous>, transform_indices = @transform_4, window_bounds = array<i64: 1, 32>}, {pipeline_mode = #tpu.pipeline_mode<synchronous>, transform_indices = @transform_5, window_bounds = array<i64: 1, 32>}, {pipeline_mode = #tpu.pipeline_mode<synchronous>, transform_indices = @transform_6, window_bounds = array<i64: 32, 96>}, {pipeline_mode = #tpu.pipeline_mode<synchronous>, transform_indices = @transform_7, window_bounds = array<i64: 1, 96>}, {pipeline_mode = #tpu.pipeline_mode<synchronous>, transform_indices = @transform_8, window_bounds = array<i64: 32, 32>}, {pipeline_mode = #tpu.pipeline_mode<synchronous>, transform_indices = @transform_9, window_bounds = array<i64: 1, 32>}, {pipeline_mode = #tpu.pipeline_mode<synchronous>, transform_indices = @transform_10, window_bounds = array<i64: 16, 48>}, {pipeline_mode = #tpu.pipeline_mode<synchronous>, transform_indices = @transform_11, window_bounds = array<i64: 1, 48>}, {pipeline_mode = #tpu.pipeline_mode<synchronous>, transform_indices = @transform_12, window_bounds = array<i64: 16, 16>}, {pipeline_mode = #tpu.pipeline_mode<synchronous>, transform_indices = @transform_13, window_bounds = array<i64: 1, 16>}, {transform_indices = @transform_14, window_bounds = array<i64: 2, 16, 32>}]} {
    %c0 = arith.constant 0 : index
    %c0_0 = arith.constant 0 : index
    %c0_1 = arith.constant 0 : index
    %0 = vector.load %arg1[%c0, %c0_0, %c0_1] : memref<2x16x32xf32, #tpu.memory_space<vmem>>, vector<2x16x32xf32>
    %c0_2 = arith.constant 0 : index
    %c0_3 = arith.constant 0 : index
    %1 = vector.load %arg2[%c0_2, %c0_3] : memref<16x32xf32, #tpu.memory_space<vmem>>, vector<16x32xf32>
    %2 = vector.shape_cast %1 : vector<16x32xf32> to vector<1x16x32xf32>
    %c0_4 = arith.constant 0 : index
    %c0_5 = arith.constant 0 : index
    %3 = vector.load %arg3[%c0_4, %c0_5] : memref<1x32xf32, #tpu.memory_space<vmem>>, vector<1x32xf32>
    %c0_6 = arith.constant 0 : index
    %c0_7 = arith.constant 0 : index
    %4 = vector.load %arg4[%c0_6, %c0_7] : memref<1x32xf32, #tpu.memory_space<vmem>>, vector<1x32xf32>
    %cst = arith.constant dense<0.000000e+00> : vector<2x16xf32>
    %5 = vector.multi_reduction <add>, %0, %cst [2] : vector<2x16x32xf32> to vector<2x16xf32>
    %6 = vector.shape_cast %5 : vector<2x16xf32> to vector<2x16x1xf32>
    %cst_8 = arith.constant 3.200000e+01 : f32
    %7 = vector.broadcast %cst_8 : f32 to vector<2x16x1xf32>
    %8 = arith.divf %6, %7 : vector<2x16x1xf32>
    %9 = vector.broadcast %8 : vector<2x16x1xf32> to vector<2x16x32xf32>
    %10 = arith.subf %0, %9 : vector<2x16x32xf32>
    %11 = arith.mulf %10, %10 : vector<2x16x32xf32>
    %cst_9 = arith.constant dense<0.000000e+00> : vector<2x16xf32>
    %12 = vector.multi_reduction <add>, %11, %cst_9 [2] : vector<2x16x32xf32> to vector<2x16xf32>
    %13 = vector.shape_cast %12 : vector<2x16xf32> to vector<2x16x1xf32>
    %cst_10 = arith.constant 3.200000e+01 : f32
    %14 = vector.broadcast %cst_10 : f32 to vector<2x16x1xf32>
    %15 = arith.divf %13, %14 : vector<2x16x1xf32>
    %16 = vector.broadcast %8 : vector<2x16x1xf32> to vector<2x16x32xf32>
    %17 = arith.subf %0, %16 : vector<2x16x32xf32>
    %cst_11 = arith.constant 9.99999974E-6 : f32
    %18 = vector.broadcast %cst_11 : f32 to vector<2x16x1xf32>
    %19 = arith.addf %15, %18 : vector<2x16x1xf32>
    %20 = math.rsqrt %19 : vector<2x16x1xf32>
    %21 = vector.broadcast %20 : vector<2x16x1xf32> to vector<2x16x32xf32>
    %22 = arith.mulf %17, %21 : vector<2x16x32xf32>
    %23 = vector.shape_cast %3 : vector<1x32xf32> to vector<1x1x32xf32>
    %24 = vector.broadcast %23 : vector<1x1x32xf32> to vector<2x16x32xf32>
    %25 = arith.mulf %22, %24 : vector<2x16x32xf32>
    %26 = vector.shape_cast %4 : vector<1x32xf32> to vector<1x1x32xf32>
    %27 = vector.broadcast %26 : vector<1x1x32xf32> to vector<2x16x32xf32>
    %28 = arith.addf %25, %27 : vector<2x16x32xf32>
    %29 = vector.broadcast %2 : vector<1x16x32xf32> to vector<2x16x32xf32>
    %30 = arith.addf %28, %29 : vector<2x16x32xf32>
    %31 = vector.shape_cast %30 : vector<2x16x32xf32> to vector<32x32xf32>
    %c0_12 = arith.constant 0 : index
    %c0_13 = arith.constant 0 : index
    %32 = vector.load %arg7[%c0_12, %c0_13] : memref<32x96xf32, #tpu.memory_space<vmem>>, vector<32x96xf32>
    %cst_14 = arith.constant dense<0.000000e+00> : vector<32x96xf32>
    %33 = tpu.matmul %31, %32, %cst_14 {dimension_numbers = #tpu.dot_dimension_numbers<[1], [0], [0], [1], [0, 0, 1, 1], [], []>} : vector<32x32xf32>, vector<32x96xf32>, vector<32x96xf32> -> vector<32x96xf32>
    %c0_15 = arith.constant 0 : index
    %c0_16 = arith.constant 0 : index
    %34 = vector.load %arg8[%c0_15, %c0_16] : memref<1x96xf32, #tpu.memory_space<vmem>>, vector<1x96xf32>
    %35 = vector.broadcast %34 : vector<1x96xf32> to vector<32x96xf32>
    %36 = arith.addf %33, %35 : vector<32x96xf32>
    %37 = vector.shape_cast %36 : vector<32x96xf32> to vector<2x16x96xf32>
    %38 = vector.extract_strided_slice %37 {offsets = [0, 0, 0], sizes = [2, 16, 32], strides = [1, 1, 1]} : vector<2x16x96xf32> to vector<2x16x32xf32>
    %39 = vector.extract_strided_slice %37 {offsets = [0, 0, 32], sizes = [2, 16, 32], strides = [1, 1, 1]} : vector<2x16x96xf32> to vector<2x16x32xf32>
    %40 = vector.extract_strided_slice %37 {offsets = [0, 0, 64], sizes = [2, 16, 32], strides = [1, 1, 1]} : vector<2x16x96xf32> to vector<2x16x32xf32>
    "tpu.trace_start"() <{level = 10 : i32, message = "bqd,bkd->bqk"}> : () -> ()
    %cst_17 = arith.constant dense<0.000000e+00> : vector<2x16x16xf32>
    %41 = tpu.matmul %38, %39, %cst_17 {dimension_numbers = #tpu.dot_dimension_numbers<[2], [2], [1], [1], [0, 0, 0, 1, 1, 1], [0], [0]>} : vector<2x16x32xf32>, vector<2x16x32xf32>, vector<2x16x16xf32> -> vector<2x16x16xf32>
    "tpu.trace_stop"() : () -> ()
    %cst_18 = arith.constant dense<0xFF800000> : vector<2x16xf32>
    %42 = vector.multi_reduction <maximumf>, %41, %cst_18 [2] : vector<2x16x16xf32> to vector<2x16xf32>
    %43 = vector.shape_cast %42 : vector<2x16xf32> to vector<2x16x1xf32>
    %44 = vector.broadcast %43 : vector<2x16x1xf32> to vector<2x16x16xf32>
    %45 = arith.subf %41, %44 : vector<2x16x16xf32>
    %46 = math.exp %45 : vector<2x16x16xf32>
    %cst_19 = arith.constant dense<0.000000e+00> : vector<2x16xf32>
    %47 = vector.multi_reduction <add>, %46, %cst_19 [2] : vector<2x16x16xf32> to vector<2x16xf32>
    %48 = vector.shape_cast %47 : vector<2x16xf32> to vector<2x16x1xf32>
    %49 = tpu.reciprocal %48 {approx = true} : vector<2x16x1xf32> -> vector<2x16x1xf32>
    %50 = vector.broadcast %49 : vector<2x16x1xf32> to vector<2x16x16xf32>
    %51 = arith.mulf %46, %50 : vector<2x16x16xf32>
    "tpu.trace_start"() <{level = 10 : i32, message = "bqk,bkd->bqd"}> : () -> ()
    %cst_20 = arith.constant dense<0.000000e+00> : vector<2x16x32xf32>
    %52 = tpu.matmul %51, %40, %cst_20 {dimension_numbers = #tpu.dot_dimension_numbers<[2], [1], [1], [2], [0, 0, 0, 1, 1, 2], [0], [0]>} : vector<2x16x16xf32>, vector<2x16x32xf32>, vector<2x16x32xf32> -> vector<2x16x32xf32>
    "tpu.trace_stop"() : () -> ()
    %53 = vector.shape_cast %52 : vector<2x16x32xf32> to vector<32x32xf32>
    %c0_21 = arith.constant 0 : index
    %c0_22 = arith.constant 0 : index
    %54 = vector.load %arg9[%c0_21, %c0_22] : memref<32x32xf32, #tpu.memory_space<vmem>>, vector<32x32xf32>
    %cst_23 = arith.constant dense<0.000000e+00> : vector<32x32xf32>
    %55 = tpu.matmul %53, %54, %cst_23 {dimension_numbers = #tpu.dot_dimension_numbers<[1], [0], [0], [1], [0, 0, 1, 1], [], []>} : vector<32x32xf32>, vector<32x32xf32>, vector<32x32xf32> -> vector<32x32xf32>
    %c0_24 = arith.constant 0 : index
    %c0_25 = arith.constant 0 : index
    %56 = vector.load %arg10[%c0_24, %c0_25] : memref<1x32xf32, #tpu.memory_space<vmem>>, vector<1x32xf32>
    %57 = vector.broadcast %56 : vector<1x32xf32> to vector<32x32xf32>
    %58 = arith.addf %55, %57 : vector<32x32xf32>
    %59 = vector.shape_cast %58 : vector<32x32xf32> to vector<2x16x32xf32>
    %60 = arith.addf %0, %59 : vector<2x16x32xf32>
    %c0_26 = arith.constant 0 : index
    %c0_27 = arith.constant 0 : index
    %61 = vector.load %arg5[%c0_26, %c0_27] : memref<1x32xf32, #tpu.memory_space<vmem>>, vector<1x32xf32>
    %c0_28 = arith.constant 0 : index
    %c0_29 = arith.constant 0 : index
    %62 = vector.load %arg6[%c0_28, %c0_29] : memref<1x32xf32, #tpu.memory_space<vmem>>, vector<1x32xf32>
    %cst_30 = arith.constant dense<0.000000e+00> : vector<2x16xf32>
    %63 = vector.multi_reduction <add>, %60, %cst_30 [2] : vector<2x16x32xf32> to vector<2x16xf32>
    %64 = vector.shape_cast %63 : vector<2x16xf32> to vector<2x16x1xf32>
    %cst_31 = arith.constant 3.200000e+01 : f32
    %65 = vector.broadcast %cst_31 : f32 to vector<2x16x1xf32>
    %66 = arith.divf %64, %65 : vector<2x16x1xf32>
    %67 = vector.broadcast %66 : vector<2x16x1xf32> to vector<2x16x32xf32>
    %68 = arith.subf %60, %67 : vector<2x16x32xf32>
    %69 = arith.mulf %68, %68 : vector<2x16x32xf32>
    %cst_32 = arith.constant dense<0.000000e+00> : vector<2x16xf32>
    %70 = vector.multi_reduction <add>, %69, %cst_32 [2] : vector<2x16x32xf32> to vector<2x16xf32>
    %71 = vector.shape_cast %70 : vector<2x16xf32> to vector<2x16x1xf32>
    %cst_33 = arith.constant 3.200000e+01 : f32
    %72 = vector.broadcast %cst_33 : f32 to vector<2x16x1xf32>
    %73 = arith.divf %71, %72 : vector<2x16x1xf32>
    %74 = vector.broadcast %66 : vector<2x16x1xf32> to vector<2x16x32xf32>
    %75 = arith.subf %60, %74 : vector<2x16x32xf32>
    %cst_34 = arith.constant 9.99999974E-6 : f32
    %76 = vector.broadcast %cst_34 : f32 to vector<2x16x1xf32>
    %77 = arith.addf %73, %76 : vector<2x16x1xf32>
    %78 = math.rsqrt %77 : vector<2x16x1xf32>
    %79 = vector.broadcast %78 : vector<2x16x1xf32> to vector<2x16x32xf32>
    %80 = arith.mulf %75, %79 : vector<2x16x32xf32>
    %81 = vector.shape_cast %61 : vector<1x32xf32> to vector<1x1x32xf32>
    %82 = vector.broadcast %81 : vector<1x1x32xf32> to vector<2x16x32xf32>
    %83 = arith.mulf %80, %82 : vector<2x16x32xf32>
    %84 = vector.shape_cast %62 : vector<1x32xf32> to vector<1x1x32xf32>
    %85 = vector.broadcast %84 : vector<1x1x32xf32> to vector<2x16x32xf32>
    %86 = arith.addf %83, %85 : vector<2x16x32xf32>
    %87 = vector.broadcast %2 : vector<1x16x32xf32> to vector<2x16x32xf32>
    %88 = arith.addf %86, %87 : vector<2x16x32xf32>
    %89 = tpu.transpose %88, [0, 2, 1] : vector<2x16x32xf32> -> vector<2x32x16xf32>
    %90 = vector.shape_cast %89 : vector<2x32x16xf32> to vector<64x16xf32>
    %c0_35 = arith.constant 0 : index
    %c0_36 = arith.constant 0 : index
    %91 = vector.load %arg11[%c0_35, %c0_36] : memref<16x48xf32, #tpu.memory_space<vmem>>, vector<16x48xf32>
    %cst_37 = arith.constant dense<0.000000e+00> : vector<64x48xf32>
    %92 = tpu.matmul %90, %91, %cst_37 {dimension_numbers = #tpu.dot_dimension_numbers<[1], [0], [0], [1], [0, 0, 1, 1], [], []>} : vector<64x16xf32>, vector<16x48xf32>, vector<64x48xf32> -> vector<64x48xf32>
    %c0_38 = arith.constant 0 : index
    %c0_39 = arith.constant 0 : index
    %93 = vector.load %arg12[%c0_38, %c0_39] : memref<1x48xf32, #tpu.memory_space<vmem>>, vector<1x48xf32>
    %94 = vector.broadcast %93 : vector<1x48xf32> to vector<64x48xf32>
    %95 = arith.addf %92, %94 : vector<64x48xf32>
    %96 = vector.shape_cast %95 : vector<64x48xf32> to vector<2x32x48xf32>
    %97 = vector.extract_strided_slice %96 {offsets = [0, 0, 0], sizes = [2, 32, 16], strides = [1, 1, 1]} : vector<2x32x48xf32> to vector<2x32x16xf32>
    %98 = vector.extract_strided_slice %96 {offsets = [0, 0, 16], sizes = [2, 32, 16], strides = [1, 1, 1]} : vector<2x32x48xf32> to vector<2x32x16xf32>
    %99 = vector.extract_strided_slice %96 {offsets = [0, 0, 32], sizes = [2, 32, 16], strides = [1, 1, 1]} : vector<2x32x48xf32> to vector<2x32x16xf32>
    "tpu.trace_start"() <{level = 10 : i32, message = "bdm,bem->bde"}> : () -> ()
    %cst_40 = arith.constant dense<0.000000e+00> : vector<2x32x32xf32>
    %100 = tpu.matmul %97, %98, %cst_40 {dimension_numbers = #tpu.dot_dimension_numbers<[2], [2], [1], [1], [0, 0, 0, 1, 1, 1], [0], [0]>} : vector<2x32x16xf32>, vector<2x32x16xf32>, vector<2x32x32xf32> -> vector<2x32x32xf32>
    "tpu.trace_stop"() : () -> ()
    %cst_41 = arith.constant dense<0xFF800000> : vector<2x32xf32>
    %101 = vector.multi_reduction <maximumf>, %100, %cst_41 [2] : vector<2x32x32xf32> to vector<2x32xf32>
    %102 = vector.shape_cast %101 : vector<2x32xf32> to vector<2x32x1xf32>
    %103 = vector.broadcast %102 : vector<2x32x1xf32> to vector<2x32x32xf32>
    %104 = arith.subf %100, %103 : vector<2x32x32xf32>
    %105 = math.exp %104 : vector<2x32x32xf32>
    %cst_42 = arith.constant dense<0.000000e+00> : vector<2x32xf32>
    %106 = vector.multi_reduction <add>, %105, %cst_42 [2] : vector<2x32x32xf32> to vector<2x32xf32>
    %107 = vector.shape_cast %106 : vector<2x32xf32> to vector<2x32x1xf32>
    %108 = tpu.reciprocal %107 {approx = true} : vector<2x32x1xf32> -> vector<2x32x1xf32>
    %109 = vector.broadcast %108 : vector<2x32x1xf32> to vector<2x32x32xf32>
    %110 = arith.mulf %105, %109 : vector<2x32x32xf32>
    "tpu.trace_start"() <{level = 10 : i32, message = "bde,bel->bdl"}> : () -> ()
    %cst_43 = arith.constant dense<0.000000e+00> : vector<2x32x16xf32>
    %111 = tpu.matmul %110, %99, %cst_43 {dimension_numbers = #tpu.dot_dimension_numbers<[2], [1], [1], [2], [0, 0, 0, 1, 1, 2], [0], [0]>} : vector<2x32x32xf32>, vector<2x32x16xf32>, vector<2x32x16xf32> -> vector<2x32x16xf32>
    "tpu.trace_stop"() : () -> ()
    %112 = vector.shape_cast %111 : vector<2x32x16xf32> to vector<64x16xf32>
    %c0_44 = arith.constant 0 : index
    %c0_45 = arith.constant 0 : index
    %113 = vector.load %arg13[%c0_44, %c0_45] : memref<16x16xf32, #tpu.memory_space<vmem>>, vector<16x16xf32>
    %cst_46 = arith.constant dense<0.000000e+00> : vector<64x16xf32>
    %114 = tpu.matmul %112, %113, %cst_46 {dimension_numbers = #tpu.dot_dimension_numbers<[1], [0], [0], [1], [0, 0, 1, 1], [], []>} : vector<64x16xf32>, vector<16x16xf32>, vector<64x16xf32> -> vector<64x16xf32>
    %c0_47 = arith.constant 0 : index
    %c0_48 = arith.constant 0 : index
    %115 = vector.load %arg14[%c0_47, %c0_48] : memref<1x16xf32, #tpu.memory_space<vmem>>, vector<1x16xf32>
    %116 = vector.broadcast %115 : vector<1x16xf32> to vector<64x16xf32>
    %117 = arith.addf %114, %116 : vector<64x16xf32>
    %118 = vector.shape_cast %117 : vector<64x16xf32> to vector<2x32x16xf32>
    %119 = tpu.transpose %118, [0, 2, 1] : vector<2x32x16xf32> -> vector<2x16x32xf32>
    %120 = arith.addf %60, %119 : vector<2x16x32xf32>
    %c0_49 = arith.constant 0 : index
    %c0_50 = arith.constant 0 : index
    %c0_51 = arith.constant 0 : index
    %121 = vector.load %arg15[%c0_49, %c0_50, %c0_51] : memref<2x16x32xf32, #tpu.memory_space<vmem>>, vector<2x16x32xf32>
    tpu.vector_store %arg15[%c0_49, %c0_50, %c0_51], %120 {strides = array<i32>} : memref<2x16x32xf32, #tpu.memory_space<vmem>>, vector<2x16x32xf32>,
    return
  }
  func.func @transform_0(%arg0: i32) -> (i32, i32, i32) {
    %c0_i32 = arith.constant 0 : i32
    %c0_i32_0 = arith.constant 0 : i32
    %c0_i32_1 = arith.constant 0 : i32
    return %arg0, %c0_i32, %c0_i32_0 : i32, i32, i32
  }
  func.func @transform_1(%arg0: i32) -> (i32, i32) {
    %c0_i32 = arith.constant 0 : i32
    %c0_i32_0 = arith.constant 0 : i32
    %c0_i32_1 = arith.constant 0 : i32
    return %c0_i32, %c0_i32_0 : i32, i32
  }
  func.func @transform_2(%arg0: i32) -> (i32, i32) {
    %c0_i32 = arith.constant 0 : i32
    %c0_i32_0 = arith.constant 0 : i32
    %c0_i32_1 = arith.constant 0 : i32
    return %c0_i32, %c0_i32_0 : i32, i32
  }
  func.func @transform_3(%arg0: i32) -> (i32, i32) {
    %c0_i32 = arith.constant 0 : i32
    %c0_i32_0 = arith.constant 0 : i32
    %c0_i32_1 = arith.constant 0 : i32
    return %c0_i32, %c0_i32_0 : i32, i32
  }
  func.func @transform_4(%arg0: i32) -> (i32, i32) {
    %c0_i32 = arith.constant 0 : i32
    %c0_i32_0 = arith.constant 0 : i32
    %c0_i32_1 = arith.constant 0 : i32
    return %c0_i32, %c0_i32_0 : i32, i32
  }
  func.func @transform_5(%arg0: i32) -> (i32, i32) {
    %c0_i32 = arith.constant 0 : i32
    %c0_i32_0 = arith.constant 0 : i32
    %c0_i32_1 = arith.constant 0 : i32
    return %c0_i32, %c0_i32_0 : i32, i32
  }
  func.func @transform_6(%arg0: i32) -> (i32, i32) {
    %c0_i32 = arith.constant 0 : i32
    %c0_i32_0 = arith.constant 0 : i32
    %c0_i32_1 = arith.constant 0 : i32
    return %c0_i32, %c0_i32_0 : i32, i32
  }
  func.func @transform_7(%arg0: i32) -> (i32, i32) {
    %c0_i32 = arith.constant 0 : i32
    %c0_i32_0 = arith.constant 0 : i32
    %c0_i32_1 = arith.constant 0 : i32
    return %c0_i32, %c0_i32_0 : i32, i32
  }
  func.func @transform_8(%arg0: i32) -> (i32, i32) {
    %c0_i32 = arith.constant 0 : i32
    %c0_i32_0 = arith.constant 0 : i32
    %c0_i32_1 = arith.constant 0 : i32
    return %c0_i32, %c0_i32_0 : i32, i32
  }
  func.func @transform_9(%arg0: i32) -> (i32, i32) {
    %c0_i32 = arith.constant 0 : i32
    %c0_i32_0 = arith.constant 0 : i32
    %c0_i32_1 = arith.constant 0 : i32
    return %c0_i32, %c0_i32_0 : i32, i32
  }
  func.func @transform_10(%arg0: i32) -> (i32, i32) {
    %c0_i32 = arith.constant 0 : i32
    %c0_i32_0 = arith.constant 0 : i32
    %c0_i32_1 = arith.constant 0 : i32
    return %c0_i32, %c0_i32_0 : i32, i32
  }
  func.func @transform_11(%arg0: i32) -> (i32, i32) {
    %c0_i32 = arith.constant 0 : i32
    %c0_i32_0 = arith.constant 0 : i32
    %c0_i32_1 = arith.constant 0 : i32
    return %c0_i32, %c0_i32_0 : i32, i32
  }
  func.func @transform_12(%arg0: i32) -> (i32, i32) {
    %c0_i32 = arith.constant 0 : i32
    %c0_i32_0 = arith.constant 0 : i32
    %c0_i32_1 = arith.constant 0 : i32
    return %c0_i32, %c0_i32_0 : i32, i32
  }
  func.func @transform_13(%arg0: i32) -> (i32, i32) {
    %c0_i32 = arith.constant 0 : i32
    %c0_i32_0 = arith.constant 0 : i32
    %c0_i32_1 = arith.constant 0 : i32
    return %c0_i32, %c0_i32_0 : i32, i32
  }
  func.func @transform_14(%arg0: i32) -> (i32, i32, i32) {
    %c0_i32 = arith.constant 0 : i32
    %c0_i32_0 = arith.constant 0 : i32
    %c0_i32_1 = arith.constant 0 : i32
    return %arg0, %c0_i32, %c0_i32_0 : i32, i32, i32
  }
}

</mosaic_0001>

<bundles_post_ra>
// kernel: conformer_attention.1
= control target key start
LH: loop header
LB: loop body
LE: loop exit
PB: predicated region body
PF: predicated region fallthrough
CT: control target
= control target key end

     0   :  { %19 = vsyncpa [#allocation3], 0  ;;  %s2760_s0 = inlined_call_operand.hbm [shape: f32[2,16,32], index: 0, kind: input, shape index: {}, may-alias: {0,14}]   ;;  %s2761_s1 = inlined_call_operand.vmem [shape: f32[16,32], index: 1, kind: input, shape index: {}]   ;;  %s2762_s2 = inlined_call_operand.vmem [shape: f32[1,32], index: 2, kind: input, shape index: {}]   ;;  %s2763_s3 = inlined_call_operand.vmem [shape: f32[1,32], index: 3, kind: input, shape index: {}]   ;;  %s2764_s4 = inlined_call_operand.vmem [shape: f32[1,32], index: 4, kind: input, shape index: {}]   ;;  %s2765_s5 = inlined_call_operand.vmem [shape: f32[1,32], index: 5, kind: input, shape index: {}]   ;;  %s2766_s6 = inlined_call_operand.vmem [shape: f32[32,96], index: 6, kind: input, shape index: {}]   ;;  %s2767_s7 = inlined_call_operand.vmem [shape: f32[1,96], index: 7, kind: input, shape index: {}]   ;;  %s2768_s8 = inlined_call_operand.vmem [shape: f32[32,32], index: 8, kind: input, shape index: {}]   ;;  %s2769_s9 = inlined_call_operand.vmem [shape: f32[1,32], index: 9, kind: input, shape index: {}]   ;;  %s2770_s10 = inlined_call_operand.vmem [shape: f32[16,48], index: 10, kind: input, shape index: {}]   ;;  %s2771_s11 = inlined_call_operand.vmem [shape: f32[1,48], index: 11, kind: input, shape index: {}]   ;;  %s2772_s12 = inlined_call_operand.vmem [shape: f32[16,16], index: 12, kind: input, shape index: {}]   ;;  %s2773_s13 = inlined_call_operand.vmem [shape: f32[1,16], index: 13, kind: input, shape index: {}]   ;;  %s2774_s14 = inlined_call_operand.hbm [shape: f32[2,16,32], index: 14, kind: output, shape index: {}, may-alias: {0,14}]  }
   0x1   :  { %20 = vsyncpa [#allocation4], 0  ;;  %s2364_s29 = smov [#allocation2]   ;;  %s2316_s17 = scalar_lea.hbm %s2760_s0, 512 }
   0x2   :  { %s26_s30 = sshll.u32 %s2364_s29, 4  ;;  %p2317_p0 = scmp.ne.s32.totalorder %s2760_s0, %s2316_s17  ;;  %s27_s30 = int_to_ptr.vmem [resolvable:$true] %s26_s30 }
   0x3   :  { %p2320_p1 = scmp.lt.u32.totalorder %s2316_s17, %s2760_s0 }
   0x5   :  { %p2322_p2 = pnand %p2320_p1, %p2317_p0 }
   0x7   :  { %2325 = shalt.err (!%p2322_p2)
}
   0x8   :  { %s2326_s22 = scalar_lea.vmem %s27_s30, 512  ;;  %p2331_p4 = scmp.lt.s32.totalorder %s27_s30, %s27_s30 }
   0x9   :  { %p2327_p3 = scmp.ne.s32.totalorder %s27_s30, %s2326_s22  ;;  %p2332_p5 = scmp.lt.s32.totalorder %s2326_s22, %s2326_s22 }
   0xb   :  { %p2333_p6 = por %p2332_p5, %p2331_p4 }
   0xd   :  { %p2334_p7 = pnand %p2333_p6, %p2327_p3 }
   0xf   :  { %2337 = shalt.err (!%p2334_p7)
}
  0x10   :  { %s2365_s23 = smov 128   ;;  %s2366_s24 = smov 8  }
  0x11   :  { %32 = dma.hbm_to_vmem [thread:$0]  %s2760_s0, 512, %s27_s30, [#allocation3], %s2365_s23, %s2365_s23, %s2366_s24  }
  0x12   :  { %2360 = dma.done.wait [#allocation3], 512  }
  0x13   :  { %2361 = vsyncadd [#allocation3], 4294966784  ;;  %vm70_vm0 = vcmask 261120   ;;  %v2461_v0 = vld [vmem:[#allocation2] sm:$0xff]  ;;  %v2463_v1 = vld [vmem:[#allocation2 + $0x10] sm:$0xff]  ;;  %s2367_s26 = smov 96  }
  0x14   :  { %v2465_v2 = vld [vmem:[#allocation2 + $0x8] sm:$0xff]  ;;  %v71_v3 = vsel %vm70_vm0, %v2461_v0, 0.0  ;;  %v77_v4 = vsel %vm70_vm0, %v2463_v1, 0.0  ;;  %v2471_v5 = vld [vmem:[#allocation2 + $0x18] sm:$0xff]  ;;  %v148_v28 = vld [vmem:[%s2766_s6] sm:$0xff]  ;;  %vm434_vm2 = vcmask 130048  }
  0x15   :  { %72 = vadd.xlane.f32.xlu0 %v71_v3  ;;  %78 = vadd.xlane.f32.xlu1 %v77_v4  ;;  %v74_v6 = vsel %vm70_vm0, %v2465_v2, 0.0  ;;  %v80_v7 = vsel %vm70_vm0, %v2471_v5, 0.0  ;;  %v149_v29 = vld [vmem:[%s2766_s6 + $0x8] sm:$0xff]  ;;  %v150_v31 = vld [vmem:[%s2766_s6 + $0x10] sm:$0xff]  ;;  %v151_v32 = vld [vmem:[%s2766_s6 + $0x18] sm:$0xff]  ;;  %s2369_s25 = smov 112  }
  0x16   :  { %v2100_v30 = vpack.c.bf16 %v149_v29, %v148_v28  ;;  %v2104_v33 = vpack.c.bf16 %v151_v32, %v150_v31  ;;  %v1804_v47 = vld [vmem:[%s2762_s2] ss:$0 sm:$0xff]  ;;  %v2512_v60 = vld [vmem:[%s2761_s1 + $0x8] sm:$0xff]  ;;  %vm2109_vm1 = vmpackc.low %vm70_vm0, %vm70_vm0 }
  0x17   :  { %v1805_v49 = vld [vmem:[%s2763_s3] ss:$0 sm:$0xff]  ;;  %vm2638_vm3 = vmpackc.low %vm434_vm2, %vm434_vm2 }
  0x18   :  { %2101 = vmatprep.subr.bf16.mxu0 %v2100_v30  ;;  %v2506_v52 = vld [vmem:[%s2761_s1] sm:$0xff] }
  0x19   :  { %75 = vadd.xlane.f32.xlu0 %v74_v6  ;;  %81 = vadd.xlane.f32.xlu1 %v80_v7 }
  0x1a   :  { %2103 = vmatpush3.bf16.msra.mxu0 %v2100_v30 }
  0x1b   :  { %2105 = vmatprep.subr.bf16.mxu0 %v2104_v33 }
  0x1e   :  { %2107 = vmatpush3.bf16.msra.mxu0 %v2104_v33 }
  0xa2   :  { %v73_v8 = vpop.xlane.xlu0 %72  ;;  %v79_v9 = vpop.xlane.xlu1 %78 }
  0xa3   :  { %v84_v10 = vmul.f32 0.03125, %v73_v8  ;;  %v86_v11 = vmul.f32 0.03125, %v79_v9 }
  0xa5   :  { %v88_v12 = vsub.f32 %v2461_v0, %v84_v10  ;;  %v90_v13 = vsub.f32 %v2463_v1, %v86_v11  ;;  %v1806_v10 = vld [vmem:[%s2767_s7] ss:$0 sm:$0xff]  ;;  %s2368_s7 = smov 64  }
  0xa6   :  { %v76_v14 = vpop.xlane.xlu0 %75  ;;  %v82_v15 = vpop.xlane.xlu1 %81 }
  0xa7   :  { %v85_v16 = vmul.f32 0.03125, %v76_v14  ;;  %v87_v17 = vmul.f32 0.03125, %v82_v15  ;;  %v92_v18 = vmul.f32 %v88_v12, %v88_v12  ;;  %v94_v19 = vmul.f32 %v90_v13, %v90_v13 }
  0xa9   :  { %v89_v20 = vsub.f32 %v2465_v2, %v85_v16  ;;  %v91_v21 = vsub.f32 %v2471_v5, %v87_v17  ;;  %v96_v22 = vsel %vm70_vm0, %v92_v18, 0.0  ;;  %v102_v23 = vsel %vm70_vm0, %v94_v19, 0.0 }
  0xaa   :  { %97 = vadd.xlane.f32.xlu0 %v96_v22 }
  0xab   :  { %v93_v24 = vmul.f32 %v89_v20, %v89_v20  ;;  %v95_v25 = vmul.f32 %v91_v21, %v91_v21 }
  0xad   :  { %v99_v26 = vsel %vm70_vm0, %v93_v24, 0.0  ;;  %v105_v27 = vsel %vm70_vm0, %v95_v25, 0.0 }
  0xae   :  { %103 = vadd.xlane.f32.xlu0 %v102_v23  ;;  %100 = vadd.xlane.f32.xlu1 %v99_v26 }
  0xb2   :  { %106 = vadd.xlane.f32.xlu1 %v105_v27 }
 0x137   :  { %v98_v34 = vpop.xlane.xlu0 %97 }
 0x138   :  { %v108_v35 = vmul.f32 0.03125, %v98_v34 }
 0x13a   :  { %v112_v36 = vadd.f32 1e-05, %v108_v35 }
 0x13b   :  { %v101_v37 = vpop.xlane.xlu1 %100  ;;  %v104_v38 = vpop.xlane.xlu0 %103 }
 0x13c   :  { %2252 = vrsqrt.f32 %v112_v36  ;;  %v109_v39 = vmul.f32 0.03125, %v101_v37  ;;  %v110_v40 = vmul.f32 0.03125, %v104_v38 }
 0x13e   :  { %v113_v41 = vadd.f32 1e-05, %v109_v39  ;;  %v114_v42 = vadd.f32 1e-05, %v110_v40 }
 0x13f   :  { %v107_v43 = vpop.xlane.xlu1 %106 }
 0x140   :  { %2254 = vrsqrt.f32 %v113_v41  ;;  %v111_v44 = vmul.f32 0.03125, %v107_v43 }
 0x141   :  { %2256 = vrsqrt.f32 %v114_v42 }
 0x142   :  { %v115_v45 = vadd.f32 1e-05, %v111_v44 }
 0x144   :  { %2258 = vrsqrt.f32 %v115_v45 }
 0x146   :  { %v2253_v46 = vpop.eup %2252 }
 0x147   :  { %v120_v48 = vmul.f32 %v2253_v46, %v88_v12 }
 0x149   :  { %v130_v50 = vmul.f32 %v1804_v47, %v120_v48 }
 0x14a   :  { %v2255_v51 = vpop.eup %2254 }
 0x14b   :  { %v2257_v53 = vpop.eup %2256  ;;  %v121_v54 = vmul.f32 %v2255_v51, %v89_v20  ;;  %v140_v55 = vadd.f32 %v1805_v49, %v130_v50 }
 0x14c   :  { %v122_v56 = vmul.f32 %v2257_v53, %v90_v13 }
 0x14d   :  { %v144_v57 = vadd.f32 %v140_v55, %v2506_v52  ;;  %v131_v58 = vmul.f32 %v1804_v47, %v121_v54 }
 0x14e   :  { %v2259_v59 = vpop.eup %2258  ;;  %v132_v61 = vmul.f32 %v1804_v47, %v122_v56 }
 0x14f   :  { %v123_v62 = vmul.f32 %v2259_v59, %v91_v21  ;;  %1964 = vmatprep.mubr.msk.f32.mxu0 %vm70_vm0, %v144_v57  ;;  %v141_v63 = vadd.f32 %v1805_v49, %v131_v58  ;;  %v653_v58 = vld [vmem:[%s2768_s8] sm:$0xff]  ;;  %v654_v59 = vld [vmem:[%s2768_s8 + $0x8] sm:$0xff] }
 0x150   :  { %v142_v3 = vadd.f32 %v1805_v49, %v132_v61  ;;  %v655_v61 = vld [vmem:[%s2768_s8 + $0x10] sm:$0xff] }
 0x151   :  { %v145_v4 = vadd.f32 %v141_v63, %v2512_v60  ;;  %v133_v6 = vmul.f32 %v1804_v47, %v123_v62  ;;  %v2128_v62 = vpack.c.bf16 %v654_v59, %v653_v58  ;;  %v656_v63 = vld [vmem:[%s2768_s8 + $0x18] sm:$0xff] }
 0x152   :  { %v146_v7 = vadd.f32 %v142_v3, %v2506_v52  ;;  %v2132_v3 = vpack.c.bf16 %v656_v63, %v655_v61 }
 0x153   :  { %1965 = vmatmul.mubr.msk.f32.vlgmr.msra.gmra.mrb[0].mxu0 %vm70_vm0, %v145_v4  ;;  %v143_v8 = vadd.f32 %v1805_v49, %v133_v6 }
 0x154   :  { %1967 = vmatprep.mubr.msk.f32.mxu0 %vm70_vm0, %v146_v7 }
 0x155   :  { %v147_v9 = vadd.f32 %v143_v8, %v2512_v60 }
 0x157   :  { %1968 = vmatmul.mubr.msk.f32.gmra.mrb[2].mxu0 %vm70_vm0, %v147_v9 }
 0x226   :  { %v1966_v11 = vpop.f32.mrb[0].mxu0 }
 0x227   :  { %v243_v12 = vadd.f32 %v1966_v11, %v1806_v10  ;;  %v237_v13 = vpop.f32.mrb[1].mxu0 }
 0x228   :  { %v238_v14 = vadd.f32 %v1806_v10, %v237_v13 }
 0x22a   :  { %v1969_v15 = vpop.f32.mrb[2].mxu0  ;;  %1974 = vmatprep.mubr.msk.f32.mxu0 %vm70_vm0, %v238_v14  ;;  %v2525_v16 = vpack.i.bf16 %v243_v12, %v238_v14 }
 0x22b   :  { %v253_v17 = vadd.f32 %v1969_v15, %v1806_v10  ;;  %v247_v18 = vpop.f32.mrb[3].mxu0 }
 0x22c   :  { %v248_v19 = vadd.f32 %v1806_v10, %v247_v18  ;;  %2193 = vrot.lane.b32.xlu0 %v2525_v16, %s2367_s26 }
 0x22e   :  { %v2197_v20 = vpack.i.bf16 %v253_v17, %v248_v19 }
 0x230   :  { %2198 = vrot.lane.b32.xlu1 %v2197_v20, %s2367_s26 }
 0x29e   :  { %v2194_v21 = vpop.permute.xlu0 %2193 }
 0x29f   :  { %v2196_v22 = vunpack.i.h.bf16 %v2194_v21  ;;  %v2195_v23 = vunpack.i.l.bf16 %v2194_v21 }
 0x2a1   :  { %v2108_v24 = vpack.c.bf16 %v2196_v22, %v2195_v23 }
 0x2a2   :  { %v2199_v25 = vpop.permute.xlu1 %2198 }
 0x2a3   :  { %v2201_v26 = vunpack.i.h.bf16 %v2199_v25  ;;  %v2200_v27 = vunpack.i.l.bf16 %v2199_v25  ;;  %2110 = vmatprep.subr.msk.bf16.mxu0 %vm2109_vm1, %v2108_v24 }
 0x2a4   :  { %2113 = vmatpush3.bf16.xpose.msk.msra.mxu0 %vm2109_vm1, %v2108_v24 }
 0x2a5   :  { %v2114_v28 = vpack.c.bf16 %v2201_v26, %v2200_v27 }
 0x2a7   :  { %2116 = vmatprep.subr.msk.bf16.mxu0 %vm2109_vm1, %v2114_v28 }
 0x2ab   :  { %1975 = vmatmul.mubr.msk.f32.vlgmr.msra.gmra.mrb[4].mxu0 %vm70_vm0, %v243_v12 }
 0x2ac   :  { %2119 = vmatpush3.bf16.xpose.msk.msra.mxu0 %vm2109_vm1, %v2114_v28  ;;  %1981 = vmatprep.mubr.msk.f32.mxu0 %vm70_vm0, %v248_v19 }
 0x2ad   :  { %2129 = vmatprep.subr.bf16.mxu0 %v2128_v62 }
 0x2b3   :  { %1982 = vmatmul.mubr.msk.f32.vlgmr.msra.gmra.mrb[6].mxu0 %vm70_vm0, %v253_v17 }
 0x2b4   :  { %2131 = vmatpush3.bf16.msra.mxu0 %v2128_v62 }
 0x2b5   :  { %2133 = vmatprep.subr.bf16.mxu0 %v2132_v3 }
 0x2b8   :  { %2135 = vmatpush3.bf16.msra.mxu0 %v2132_v3 }
 0x37e   :  { %v1976_v29 = vpop.f32.mrb[4].mxu0 }
 0x37f   :  { %v336_v30 = vpop.f32.mrb[5].mxu0  ;;  %v438_v31 = vsel %vm434_vm2, %v1976_v29, -inf }
 0x380   :  { %439 = vmax.xlane.f32.xlu0 %v438_v31  ;;  %v435_v32 = vsel %vm434_vm2, %v336_v30, -inf }
 0x381   :  { %436 = vmax.xlane.f32.xlu1 %v435_v32 }
 0x386   :  { %v1983_v33 = vpop.f32.mrb[6].mxu0 }
 0x387   :  { %v425_v34 = vpop.f32.mrb[7].mxu0  ;;  %v444_v35 = vsel %vm434_vm2, %v1983_v33, -inf }
 0x388   :  { %445 = vmax.xlane.f32.xlu1 %v444_v35  ;;  %v441_v36 = vsel %vm434_vm2, %v425_v34, -inf }
 0x389   :  { %442 = vmax.xlane.f32.xlu0 %v441_v36 }
 0x40d   :  { %v440_v37 = vpop.xlane.xlu0 %439 }
 0x40e   :  { %v448_v38 = vsub.f32 %v1976_v29, %v440_v37  ;;  %v437_v39 = vpop.xlane.xlu1 %436  ;;  %v1823_v29 = vld [vmem:[%s2769_s9] ss:$0 sm:$0xff] }
 0x40f   :  { %v447_v40 = vsub.f32 %v336_v30, %v437_v39 }
 0x410   :  { %v453_v41 = vmul.f32 1.442695, %v448_v38 }
 0x411   :  { %v451_v42 = vmul.f32 1.442695, %v447_v40 }
 0x412   :  { %2260 = vpow2.f32 %v453_v41 }
 0x413   :  { %2262 = vpow2.f32 %v451_v42 }
 0x415   :  { %v446_v43 = vpop.xlane.xlu1 %445 }
 0x416   :  { %v450_v44 = vsub.f32 %v1983_v33, %v446_v43  ;;  %v443_v45 = vpop.xlane.xlu0 %442 }
 0x417   :  { %v449_v46 = vsub.f32 %v425_v34, %v443_v45 }
 0x418   :  { %v457_v47 = vmul.f32 1.442695, %v450_v44 }
 0x419   :  { %v455_v48 = vmul.f32 1.442695, %v449_v46 }
 0x41a   :  { %2264 = vpow2.f32 %v457_v47 }
 0x41b   :  { %2266 = vpow2.f32 %v455_v48 }
 0x41c   :  { %v2261_v49 = vpop.eup %2260 }
 0x41d   :  { %v2263_v50 = vpop.eup %2262  ;;  %v462_v51 = vsel %vm434_vm2, %v2261_v49, 0.0 }
 0x41e   :  { %463 = vadd.xlane.f32.xlu1 %v462_v51  ;;  %v459_v53 = vsel %vm434_vm2, %v2263_v50, 0.0 }
 0x41f   :  { %460 = vadd.xlane.f32.xlu0 %v459_v53 }
 0x424   :  { %v2265_v54 = vpop.eup %2264 }
 0x425   :  { %v2267_v55 = vpop.eup %2266  ;;  %v468_v56 = vsel %vm434_vm2, %v2265_v54, 0.0 }
 0x426   :  { %469 = vadd.xlane.f32.xlu1 %v468_v56  ;;  %v465_v57 = vsel %vm434_vm2, %v2267_v55, 0.0 }
 0x427   :  { %466 = vadd.xlane.f32.xlu0 %v465_v57 }
 0x437   :  { %2208 = vrot.lane.b32.xlu1 %v2197_v20, %s2368_s7 }
 0x43d   :  { %2203 = vrot.lane.b32.xlu0 %v2525_v16, %s2368_s7 }
 0x4ab   :  { %v464_v6 = vpop.xlane.xlu1 %463 }
 0x4ac   :  { %v461_v4 = vpop.xlane.xlu0 %460 }
 0x4ad   :  { %2268 = vrcp.f32 %v461_v4 }
 0x4ae   :  { %2270 = vrcp.f32 %v464_v6 }
 0x4b3   :  { %v470_v7 = vpop.xlane.xlu1 %469 }
 0x4b4   :  { %v467_v8 = vpop.xlane.xlu0 %466 }
 0x4b5   :  { %2272 = vrcp.f32 %v467_v8 }
 0x4b6   :  { %2274 = vrcp.f32 %v470_v7 }
 0x4b7   :  { %v2269_v9 = vpop.eup %2268  ;;  %v2209_v10 = vpop.permute.xlu1 %2208 }
 0x4b8   :  { %v2204_v11 = vpop.permute.xlu0 %2203  ;;  %v475_v12 = vmul.f32 %v2269_v9, %v2263_v50  ;;  %v2211_v13 = vunpack.i.h.bf16 %v2209_v10  ;;  %v2210_v14 = vunpack.i.l.bf16 %v2209_v10  ;;  %v2271_v18 = vpop.eup %2270 }
 0x4b9   :  { %v2206_v15 = vunpack.i.h.bf16 %v2204_v11  ;;  %v2205_v16 = vunpack.i.l.bf16 %v2204_v11  ;;  %v476_v21 = vmul.f32 %v2271_v18, %v2261_v49  ;;  %v1828_v18 = vld [vmem:[%s2764_s4] ss:$0 sm:$0xff] }
 0x4ba   :  { %1988 = vmatprep.mubr.msk.f32.mxu1 %vm434_vm2, %v475_v12  ;;  %v2124_v19 = vpack.c.bf16 %v2211_v13, %v2210_v14 }
 0x4bb   :  { %v2120_v17 = vpack.c.bf16 %v2206_v15, %v2205_v16 }
 0x4bd   :  { %2121 = vmatprep.subr.bf16.mxu1 %v2120_v17 }
 0x4be   :  { %2123 = vmatpush3.bf16.msra.mxu1 %v2120_v17 }
 0x4bf   :  { %v2273_v20 = vpop.eup %2272  ;;  %2125 = vmatprep.subr.bf16.mxu1 %v2124_v19 }
 0x4c0   :  { %v2275_v22 = vpop.eup %2274  ;;  %v477_v23 = vmul.f32 %v2273_v20, %v2267_v55 }
 0x4c1   :  { %1989 = vmatmul.mubr.msk.f32.vlgmr.msra.gmra.mrb[0].mxu1 %vm434_vm2, %v476_v21  ;;  %v478_v24 = vmul.f32 %v2275_v22, %v2265_v54  ;;  %v1829_v21 = vld [vmem:[%s2765_s5] ss:$0 sm:$0xff] }
 0x4c2   :  { %2127 = vmatpush3.bf16.msra.mxu1 %v2124_v19  ;;  %1995 = vmatprep.mubr.msk.f32.mxu1 %vm434_vm2, %v477_v23 }
 0x4c5   :  { %1996 = vmatmul.mubr.msk.f32.vlgmr.msra.gmra.mrb[2].mxu1 %vm434_vm2, %v478_v24 }
 0x594   :  { %v1990_v25 = vpop.f32.mrb[0].mxu1 }
 0x595   :  { %v557_v26 = vpop.f32.mrb[1].mxu1 }
 0x596   :  { %2006 = vmatprep.mubr.msk.f32.mxu0 %vm70_vm0, %v557_v26 }
 0x597   :  { %2007 = vmatmul.mubr.msk.f32.vlgmr.msra.gmra.mrb[8].mxu0 %vm70_vm0, %v1990_v25 }
 0x598   :  { %v1997_v27 = vpop.f32.mrb[2].mxu1 }
 0x599   :  { %v644_v28 = vpop.f32.mrb[3].mxu1 }
 0x59a   :  { %2009 = vmatprep.mubr.msk.f32.mxu0 %vm70_vm0, %v644_v28 }
 0x59b   :  { %2010 = vmatmul.mubr.msk.f32.gmra.mrb[10].mxu0 %vm70_vm0, %v1997_v27 }
 0x66a   :  { %v2008_v30 = vpop.f32.mrb[8].mxu0 }
 0x66b   :  { %v748_v31 = vadd.f32 %v2008_v30, %v1823_v29  ;;  %v742_v32 = vpop.f32.mrb[9].mxu0 }
 0x66c   :  { %v743_v33 = vadd.f32 %v1823_v29, %v742_v32 }
 0x66d   :  { %v2568_v34 = vadd.f32 %v748_v31, %v2465_v2 }
 0x66e   :  { %v2571_v35 = vadd.f32 %v743_v33, %v2461_v0  ;;  %v2011_v36 = vpop.f32.mrb[10].mxu0  ;;  %v907_v33 = vld [vmem:[%s2770_s10] sm:$0xff] }
 0x66f   :  { %v758_v37 = vadd.f32 %v2011_v36, %v1823_v29  ;;  %v752_v38 = vpop.f32.mrb[11].mxu0  ;;  %v770_v39 = vsel %vm70_vm0, %v2568_v34, 0.0  ;;  %v908_v36 = vld [vmem:[%s2770_s10 + $0x8] sm:$0xff] }
 0x670   :  { %v753_v40 = vadd.f32 %v1823_v29, %v752_v38  ;;  %771 = vadd.xlane.f32.xlu0 %v770_v39  ;;  %v767_v41 = vsel %vm70_vm0, %v2571_v35, 0.0 }
 0x671   :  { %v2578_v42 = vadd.f32 %v758_v37, %v2471_v5  ;;  %768 = vadd.xlane.f32.xlu1 %v767_v41  ;;  %v2136_v37 = vpack.c.bf16 %v908_v36, %v907_v33 }
 0x672   :  { %v2581_v2 = vadd.f32 %v753_v40, %v2463_v1 }
 0x673   :  { %v776_v0 = vsel %vm70_vm0, %v2578_v42, 0.0  ;;  %2137 = vmatprep.subr.bf16.mxu1 %v2136_v37 }
 0x674   :  { %v773_v43 = vsel %vm70_vm0, %v2581_v2, 0.0  ;;  %2139 = vmatpush3.bf16.msra.mxu1 %v2136_v37 }
 0x675   :  { %777 = vadd.xlane.f32.xlu1 %v776_v0  ;;  %774 = vadd.xlane.f32.xlu0 %v773_v43 }
 0x6fd   :  { %v772_v44 = vpop.xlane.xlu0 %771 }
 0x6fe   :  { %v780_v45 = vmul.f32 0.03125, %v772_v44  ;;  %v769_v46 = vpop.xlane.xlu1 %768 }
 0x6ff   :  { %v779_v47 = vmul.f32 0.03125, %v769_v46 }
 0x700   :  { %v784_v48 = vsub.f32 %v2568_v34, %v780_v45 }
 0x701   :  { %v783_v5 = vsub.f32 %v2571_v35, %v779_v47 }
 0x702   :  { %v778_v49 = vpop.xlane.xlu1 %777  ;;  %v775_v50 = vpop.xlane.xlu0 %774  ;;  %v788_v1 = vmul.f32 %v784_v48, %v784_v48 }
 0x703   :  { %v782_v51 = vmul.f32 0.03125, %v778_v49  ;;  %v781_v53 = vmul.f32 0.03125, %v775_v50  ;;  %v787_v54 = vmul.f32 %v783_v5, %v783_v5 }
 0x704   :  { %v794_v55 = vsel %vm70_vm0, %v788_v1, 0.0 }
 0x705   :  { %v786_v56 = vsub.f32 %v2578_v42, %v782_v51  ;;  %v785_v57 = vsub.f32 %v2581_v2, %v781_v53  ;;  %795 = vadd.xlane.f32.xlu1 %v794_v55  ;;  %v791_v58 = vsel %vm70_vm0, %v787_v54, 0.0 }
 0x706   :  { %792 = vadd.xlane.f32.xlu0 %v791_v58 }
 0x707   :  { %v790_v59 = vmul.f32 %v786_v56, %v786_v56  ;;  %v789_v61 = vmul.f32 %v785_v57, %v785_v57 }
 0x709   :  { %v800_v62 = vsel %vm70_vm0, %v790_v59, 0.0  ;;  %v797_v63 = vsel %vm70_vm0, %v789_v61, 0.0 }
 0x70a   :  { %801 = vadd.xlane.f32.xlu1 %v800_v62  ;;  %798 = vadd.xlane.f32.xlu0 %v797_v63 }
 0x792   :  { %v796_v3 = vpop.xlane.xlu1 %795 }
 0x793   :  { %v804_v4 = vmul.f32 0.03125, %v796_v3  ;;  %v793_v6 = vpop.xlane.xlu0 %792 }
 0x794   :  { %v803_v7 = vmul.f32 0.03125, %v793_v6 }
 0x795   :  { %v808_v8 = vadd.f32 1e-05, %v804_v4 }
 0x796   :  { %v807_v9 = vadd.f32 1e-05, %v803_v7 }
 0x797   :  { %2276 = vrsqrt.f32 %v808_v8  ;;  %v802_v10 = vpop.xlane.xlu1 %801  ;;  %v799_v11 = vpop.xlane.xlu0 %798 }
 0x798   :  { %2278 = vrsqrt.f32 %v807_v9  ;;  %v806_v12 = vmul.f32 0.03125, %v802_v10  ;;  %v805_v13 = vmul.f32 0.03125, %v799_v11 }
 0x79a   :  { %v810_v14 = vadd.f32 1e-05, %v806_v12  ;;  %v809_v15 = vadd.f32 1e-05, %v805_v13 }
 0x79c   :  { %2280 = vrsqrt.f32 %v810_v14 }
 0x79d   :  { %2282 = vrsqrt.f32 %v809_v15 }
 0x7a1   :  { %v2277_v16 = vpop.eup %2276 }
 0x7a2   :  { %v2279_v17 = vpop.eup %2278  ;;  %v816_v19 = vmul.f32 %v2277_v16, %v784_v48 }
 0x7a3   :  { %v815_v20 = vmul.f32 %v2279_v17, %v783_v5  ;;  %v1830_v5 = vld [vmem:[%s2771_s11] ss:$0 sm:$0xff] }
 0x7a4   :  { %v826_v23 = vmul.f32 %v1828_v18, %v816_v19 }
 0x7a5   :  { %v825_v22 = vmul.f32 %v1828_v18, %v815_v20 }
 0x7a6   :  { %v2281_v24 = vpop.eup %2280  ;;  %v836_v30 = vadd.f32 %v1829_v21, %v826_v23 }
 0x7a7   :  { %v2283_v25 = vpop.eup %2282  ;;  %v835_v26 = vadd.f32 %v1829_v21, %v825_v22  ;;  %v818_v27 = vmul.f32 %v2281_v24, %v786_v56 }
 0x7a8   :  { %v817_v28 = vmul.f32 %v2283_v25, %v785_v57  ;;  %v840_v39 = vadd.f32 %v836_v30, %v2512_v60 }
 0x7a9   :  { %v839_v29 = vadd.f32 %v835_v26, %v2506_v52  ;;  %v828_v32 = vmul.f32 %v1828_v18, %v818_v27 }
 0x7aa   :  { %v827_v31 = vmul.f32 %v1828_v18, %v817_v28 }
 0x7ab   :  { %843 = vxpose.xlu0.b32.start [1/2] (short) (narrow) %v839_v29, 32  ;;  %v838_v41 = vadd.f32 %v1829_v21, %v828_v32 }
 0x7ac   :  { %v837_v38 = vadd.f32 %v1829_v21, %v827_v31 }
 0x7ad   :  { %v842_v0 = vadd.f32 %v838_v41, %v2512_v60 }
 0x7ae   :  { %v841_v40 = vadd.f32 %v837_v38, %v2506_v52 }
 0x7af   :  { %844 = vxpose.xlu0.b32.end [2/2] (short) (narrow) %v840_v39, 32 }
 0x7b0   :  { %875 = vxpose.xlu1.b32.start [1/2] (short) (narrow) %v841_v40, 32 }
 0x7b4   :  { %876 = vxpose.xlu1.b32.end [2/2] (short) (narrow) %v842_v0, 32 }
 0x82b   :  { %v859_v43 = vpop.trf.xlu0 }
 0x82c   :  { %2016 = vmatprep.mubr.msk.f32.mxu1 %vm434_vm2, %v859_v43 }
 0x82f   :  { %v860_v44 = vpop.trf.xlu0 }
 0x830   :  { %2017 = vmatmul.mubr.msk.f32.vlgmr.msra.gmra.mrb[4].mxu1 %vm434_vm2, %v860_v44  ;;  %v891_v45 = vpop.trf.xlu1 }
 0x833   :  { %v861_v46 = vpop.trf.xlu0 }
 0x834   :  { %2019 = vmatprep.mubr.msk.f32.mxu1 %vm434_vm2, %v861_v46  ;;  %v892_v47 = vpop.trf.xlu1 }
 0x837   :  { %v862_v48 = vpop.trf.xlu0 }
 0x838   :  { %2020 = vmatmul.mubr.msk.f32.gmra.mrb[6].mxu1 %vm434_vm2, %v862_v48  ;;  %v893_v52 = vpop.trf.xlu1 }
 0x839   :  { %2022 = vmatprep.mubr.msk.f32.mxu1 %vm434_vm2, %v891_v45 }
 0x83c   :  { %2023 = vmatmul.mubr.msk.f32.gmra.mrb[8].mxu1 %vm434_vm2, %v892_v47  ;;  %v894_v60 = vpop.trf.xlu1 }
 0x83d   :  { %2025 = vmatprep.mubr.msk.f32.mxu1 %vm434_vm2, %v893_v52 }
 0x840   :  { %2026 = vmatmul.mubr.msk.f32.gmra.mrb[10].mxu1 %vm434_vm2, %v894_v60 }
 0x903   :  { %v2018_v49 = vpop.f32.mrb[4].mxu1 }
 0x904   :  { %v1012_v50 = vadd.f32 %v2018_v49, %v1830_v5  ;;  %v1006_v1 = vpop.f32.mrb[5].mxu1 }
 0x905   :  { %v1007_v51 = vadd.f32 %v1830_v5, %v1006_v1 }
 0x907   :  { %2036 = vmatprep.mubr.msk.f32.mxu1 %vm434_vm2, %v1007_v51  ;;  %v2623_v53 = vpack.i.bf16 %v1012_v50, %v1007_v51 }
 0x909   :  { %2213 = vrot.lane.b32.xlu0 %v2623_v53, %s2369_s25 }
 0x90b   :  { %v2021_v54 = vpop.f32.mrb[6].mxu1 }
 0x90c   :  { %v1022_v55 = vadd.f32 %v2021_v54, %v1830_v5  ;;  %v1016_v56 = vpop.f32.mrb[7].mxu1 }
 0x90d   :  { %v1017_v57 = vadd.f32 %v1830_v5, %v1016_v56 }
 0x90f   :  { %v2024_v58 = vpop.f32.mrb[8].mxu1  ;;  %v2626_v59 = vpack.i.bf16 %v1022_v55, %v1017_v57 }
 0x910   :  { %v1032_v61 = vadd.f32 %v2024_v58, %v1830_v5  ;;  %v1026_v62 = vpop.f32.mrb[9].mxu1 }
 0x911   :  { %v1027_v63 = vadd.f32 %v1830_v5, %v1026_v62  ;;  %2218 = vrot.lane.b32.xlu1 %v2626_v59, %s2369_s25 }
 0x913   :  { %2050 = vmatprep.mubr.msk.f32.mxu0 %vm434_vm2, %v1027_v63  ;;  %v2630_v3 = vpack.i.bf16 %v1032_v61, %v1027_v63  ;;  %v2027_v4 = vpop.f32.mrb[10].mxu1 }
 0x914   :  { %v1042_v6 = vadd.f32 %v2027_v4, %v1830_v5  ;;  %v1036_v7 = vpop.f32.mrb[11].mxu1 }
 0x915   :  { %2223 = vrot.lane.b32.xlu1 %v2630_v3, %s2369_s25  ;;  %v1037_v8 = vadd.f32 %v1830_v5, %v1036_v7 }
 0x917   :  { %v2633_v9 = vpack.i.bf16 %v1042_v6, %v1037_v8 }
 0x919   :  { %2228 = vrot.lane.b32.xlu1 %v2633_v9, %s2369_s25 }
 0x97b   :  { %v2214_v10 = vpop.permute.xlu0 %2213 }
 0x97c   :  { %v2216_v11 = vunpack.i.h.bf16 %v2214_v10  ;;  %v2215_v12 = vunpack.i.l.bf16 %v2214_v10 }
 0x97e   :  { %v2140_v14 = vpack.c.bf16 %v2216_v11, %v2215_v12 }
 0x980   :  { %2142 = vmatprep.subr.msk.bf16.mxu1 %vm2638_vm3, %v2140_v14 }
 0x981   :  { %2145 = vmatpush3.bf16.xpose.msk.msra.mxu1 %vm2638_vm3, %v2140_v14 }
 0x983   :  { %v2219_v15 = vpop.permute.xlu1 %2218 }
 0x984   :  { %v2221_v16 = vunpack.i.h.bf16 %v2219_v15  ;;  %v2220_v17 = vunpack.i.l.bf16 %v2219_v15 }
 0x986   :  { %v2146_v18 = vpack.c.bf16 %v2221_v16, %v2220_v17 }
 0x987   :  { %v2224_v19 = vpop.permute.xlu1 %2223 }
 0x988   :  { %v2226_v20 = vunpack.i.h.bf16 %v2224_v19  ;;  %v2225_v21 = vunpack.i.l.bf16 %v2224_v19  ;;  %2148 = vmatprep.subr.msk.bf16.mxu1 %vm2638_vm3, %v2146_v18 }
 0x989   :  { %2151 = vmatpush3.bf16.xpose.msk.msra.mxu1 %vm2638_vm3, %v2146_v18 }
 0x98a   :  { %v2152_v22 = vpack.c.bf16 %v2226_v20, %v2225_v21 }
 0x98b   :  { %v2229_v23 = vpop.permute.xlu1 %2228 }
 0x98c   :  { %2154 = vmatprep.subr.msk.bf16.mxu0 %vm2638_vm3, %v2152_v22  ;;  %v2231_v24 = vunpack.i.h.bf16 %v2229_v23  ;;  %v2230_v25 = vunpack.i.l.bf16 %v2229_v23 }
 0x98d   :  { %2157 = vmatpush3.bf16.xpose.msk.msra.mxu0 %vm2638_vm3, %v2152_v22 }
 0x98e   :  { %v2158_v26 = vpack.c.bf16 %v2231_v24, %v2230_v25 }
 0x990   :  { %2037 = vmatmul.mubr.msk.f32.vlgmr.msra.gmra.mrb[12].mxu1 %vm434_vm2, %v1012_v50  ;;  %2160 = vmatprep.subr.msk.bf16.mxu0 %vm2638_vm3, %v2158_v26 }
 0x991   :  { %2039 = vmatprep.mubr.msk.f32.mxu1 %vm434_vm2, %v1017_v57 }
 0x994   :  { %2040 = vmatmul.mubr.msk.f32.gmra.mrb[14].mxu1 %vm434_vm2, %v1022_v55 }
 0x995   :  { %2163 = vmatpush3.bf16.xpose.msk.msra.mxu0 %vm2638_vm3, %v2158_v26 }
 0x99c   :  { %2051 = vmatmul.mubr.msk.f32.vlgmr.msra.gmra.mrb[12].mxu0 %vm434_vm2, %v1032_v61 }
 0x99d   :  { %2053 = vmatprep.mubr.msk.f32.mxu0 %vm434_vm2, %v1037_v8 }
 0x9a0   :  { %2054 = vmatmul.mubr.msk.f32.gmra.mrb[14].mxu0 %vm434_vm2, %v1042_v6 }
 0xa63   :  { %v2038_v27 = vpop.f32.mrb[12].mxu1 }
 0xa64   :  { %v1139_v28 = vpop.f32.mrb[13].mxu1  ;;  %v1274_v29 = vsel %vm70_vm0, %v2038_v27, -inf }
 0xa65   :  { %1275 = vmax.xlane.f32.xlu1 %v1274_v29  ;;  %v1271_v30 = vsel %vm70_vm0, %v1139_v28, -inf }
 0xa66   :  { %1272 = vmax.xlane.f32.xlu0 %v1271_v30 }
 0xa67   :  { %v2041_v31 = vpop.f32.mrb[14].mxu1 }
 0xa68   :  { %v1149_v32 = vpop.f32.mrb[15].mxu1  ;;  %v1280_v33 = vsel %vm70_vm0, %v2041_v31, -inf }
 0xa69   :  { %v1277_v36 = vsel %vm70_vm0, %v1149_v32, -inf }
 0xa6a   :  { %1281 = vmax.xlane.f32.xlu0 %v1280_v33 }
 0xa6e   :  { %1278 = vmax.xlane.f32.xlu0 %v1277_v36 }
 0xa6f   :  { %v2052_v37 = vpop.f32.mrb[12].mxu0 }
 0xa70   :  { %v1252_v38 = vpop.f32.mrb[13].mxu0  ;;  %v1286_v39 = vsel %vm70_vm0, %v2052_v37, -inf }
 0xa71   :  { %1287 = vmax.xlane.f32.xlu1 %v1286_v39  ;;  %v1283_v40 = vsel %vm70_vm0, %v1252_v38, -inf }
 0xa72   :  { %1284 = vmax.xlane.f32.xlu0 %v1283_v40 }
 0xa73   :  { %v2055_v41 = vpop.f32.mrb[14].mxu0 }
 0xa74   :  { %v1262_v0 = vpop.f32.mrb[15].mxu0  ;;  %v1292_v43 = vsel %vm70_vm0, %v2055_v41, -inf }
 0xa75   :  { %1293 = vmax.xlane.f32.xlu1 %v1292_v43  ;;  %v1289_v44 = vsel %vm70_vm0, %v1262_v0, -inf }
 0xa76   :  { %1290 = vmax.xlane.f32.xlu0 %v1289_v44 }
 0xaf2   :  { %v1276_v45 = vpop.xlane.xlu1 %1275 }
 0xaf3   :  { %v1296_v46 = vsub.f32 %v2038_v27, %v1276_v45  ;;  %v1273_v47 = vpop.xlane.xlu0 %1272 }
 0xaf4   :  { %v1295_v48 = vsub.f32 %v1139_v28, %v1273_v47  ;;  %v1577_v47 = vld [vmem:[%s2772_s12] sm:$0xff] }
 0xaf5   :  { %v1305_v52 = vmul.f32 1.442695, %v1296_v46 }
 0xaf6   :  { %v1303_v60 = vmul.f32 1.442695, %v1295_v48  ;;  %v1578_v48 = vld [vmem:[%s2772_s12 + $0x8] sm:$0xff] }
 0xaf7   :  { %2284 = vpow2.f32 %v1305_v52  ;;  %v1282_v5 = vpop.xlane.xlu0 %1281 }
 0xaf8   :  { %2286 = vpow2.f32 %v1303_v60  ;;  %v1298_v49 = vsub.f32 %v2041_v31, %v1282_v5 }
 0xafa   :  { %v1309_v50 = vmul.f32 1.442695, %v1298_v49 }
 0xafb   :  { %v1279_v1 = vpop.xlane.xlu0 %1278 }
 0xafc   :  { %2288 = vpow2.f32 %v1309_v50  ;;  %v1297_v51 = vsub.f32 %v1149_v32, %v1279_v1  ;;  %v2180_v50 = vpack.c.bf16 %v1578_v48, %v1577_v47 }
 0xafe   :  { %v1307_v54 = vmul.f32 1.442695, %v1297_v51  ;;  %v1288_v55 = vpop.xlane.xlu1 %1287 }
 0xaff   :  { %v1300_v56 = vsub.f32 %v2052_v37, %v1288_v55  ;;  %v1285_v57 = vpop.xlane.xlu0 %1284 }
 0xb00   :  { %2290 = vpow2.f32 %v1307_v54  ;;  %v1299_v58 = vsub.f32 %v1252_v38, %v1285_v57 }
 0xb01   :  { %v2672_v61 = vpop.eup %2284  ;;  %v1313_v62 = vmul.f32 1.442695, %v1300_v56 }
 0xb02   :  { %v2287_v63 = vpop.eup %2286  ;;  %v1311_v4 = vmul.f32 1.442695, %v1299_v58  ;;  %v1294_v6 = vpop.xlane.xlu1 %1293  ;;  %v1322_v7 = vsel %vm70_vm0, %v2672_v61, 0.0 }
 0xb03   :  { %2292 = vpow2.f32 %v1313_v62  ;;  %v1302_v8 = vsub.f32 %v2055_v41, %v1294_v6  ;;  %1323 = vadd.xlane.f32.xlu1 %v1322_v7  ;;  %v1291_v10 = vpop.xlane.xlu0 %1290  ;;  %v1319_v11 = vsel %vm70_vm0, %v2287_v63, 0.0 }
 0xb04   :  { %2294 = vpow2.f32 %v1311_v4  ;;  %v1301_v12 = vsub.f32 %v1262_v0, %v1291_v10  ;;  %1320 = vadd.xlane.f32.xlu0 %v1319_v11 }
 0xb05   :  { %v1317_v13 = vmul.f32 1.442695, %v1302_v8 }
 0xb06   :  { %v2677_v14 = vpop.eup %2288  ;;  %v1315_v15 = vmul.f32 1.442695, %v1301_v12 }
 0xb07   :  { %2296 = vpow2.f32 %v1317_v13  ;;  %v1328_v16 = vsel %vm70_vm0, %v2677_v14, 0.0 }
 0xb08   :  { %2298 = vpow2.f32 %v1315_v15  ;;  %1329 = vadd.xlane.f32.xlu1 %v1328_v16 }
 0xb0a   :  { %v2681_v17 = vpop.eup %2290 }
 0xb0b   :  { %v1325_v18 = vsel %vm70_vm0, %v2681_v17, 0.0 }
 0xb0c   :  { %1326 = vadd.xlane.f32.xlu0 %v1325_v18  ;;  %v1863_v18 = vld [vmem:[%s2773_s13] ss:$0 sm:$0xff]  ;;  %s2370_s13 = smov [#allocation5]  }
 0xb0d   :  { %v2685_v19 = vpop.eup %2292  ;;  %s1792_s0 = sshll.u32 %s2370_s13, 4  ;;  %s1793_s0 = int_to_ptr.vmem [resolvable:$true] %s1792_s0 }
 0xb0e   :  { %v2295_v20 = vpop.eup %2294  ;;  %v1334_v21 = vsel %vm70_vm0, %v2685_v19, 0.0  ;;  %s2338_s27 = scalar_lea.vmem %s1793_s0, 512  ;;  %p2343_p9 = scmp.lt.s32.totalorder %s1793_s0, %s1793_s0 }
 0xb0f   :  { %1335 = vadd.xlane.f32.xlu1 %v1334_v21  ;;  %v1331_v22 = vsel %vm70_vm0, %v2295_v20, 0.0  ;;  %p2339_p8 = scmp.ne.s32.totalorder %s1793_s0, %s2338_s27  ;;  %p2344_p10 = scmp.lt.s32.totalorder %s2338_s27, %s2338_s27 }
 0xb10   :  { %1332 = vadd.xlane.f32.xlu0 %v1331_v22 }
 0xb11   :  { %v2690_v23 = vpop.eup %2296  ;;  %p2345_p11 = por %p2344_p10, %p2343_p9 }
 0xb12   :  { %v2692_v24 = vpop.eup %2298  ;;  %v1340_v25 = vsel %vm70_vm0, %v2690_v23, 0.0 }
 0xb13   :  { %1341 = vadd.xlane.f32.xlu1 %v1340_v25  ;;  %v1337_v26 = vsel %vm70_vm0, %v2692_v24, 0.0  ;;  %p2346_p12 = pnand %p2345_p11, %p2339_p8 }
 0xb14   :  { %1338 = vadd.xlane.f32.xlu0 %v1337_v26 }
 0xb24   :  { %2238 = vrot.lane.b32.xlu1 %v2626_v59, %s2367_s26 }
 0xb28   :  { %2243 = vrot.lane.b32.xlu1 %v2630_v3, %s2367_s26 }
 0xb2a   :  { %2233 = vrot.lane.b32.xlu0 %v2623_v53, %s2367_s26 }
 0xb2c   :  { %2248 = vrot.lane.b32.xlu1 %v2633_v9, %s2367_s26 }
 0xb90   :  { %v1324_v28 = vpop.xlane.xlu1 %1323 }
 0xb91   :  { %v1321_v27 = vpop.xlane.xlu0 %1320 }
 0xb92   :  { %2300 = vrcp.f32 %v1321_v27 }
 0xb95   :  { %v1330_v29 = vpop.xlane.xlu1 %1329 }
 0xb99   :  { %v1327_v30 = vpop.xlane.xlu0 %1326 }
 0xb9c   :  { %v2301_v31 = vpop.eup %2300  ;;  %v1336_v32 = vpop.xlane.xlu1 %1335 }
 0xb9d   :  { %v1333_v33 = vpop.xlane.xlu0 %1332  ;;  %v1351_v36 = vmul.f32 %v2301_v31, %v2287_v63 }
 0xb9e   :  { %2302 = vrcp.f32 %v1333_v33 }
 0xb9f   :  { %2064 = vmatprep.mubr.msk.f32.mxu1 %vm70_vm0, %v1351_v36  ;;  %2304 = vrcp.f32 %v1324_v28 }
 0xba0   :  { %v1342_v59 = vpop.xlane.xlu1 %1341  ;;  %2306 = vrcp.f32 %v1330_v29 }
 0xba1   :  { %v1339_v3 = vpop.xlane.xlu0 %1338  ;;  %2308 = vrcp.f32 %v1327_v30 }
 0xba2   :  { %2310 = vrcp.f32 %v1336_v32 }
 0xba3   :  { %2312 = vrcp.f32 %v1339_v3 }
 0xba4   :  { %v2239_v53 = vpop.permute.xlu1 %2238  ;;  %2314 = vrcp.f32 %v1342_v59 }
 0xba5   :  { %v2234_v9 = vpop.permute.xlu0 %2233  ;;  %v2241_v37 = vunpack.i.h.bf16 %v2239_v53  ;;  %v2240_v38 = vunpack.i.l.bf16 %v2239_v53 }
 0xba6   :  { %v2236_v39 = vunpack.i.h.bf16 %v2234_v9  ;;  %v2235_v40 = vunpack.i.l.bf16 %v2234_v9 }
 0xba7   :  { %v2168_v52 = vpack.c.bf16 %v2241_v37, %v2240_v38 }
 0xba8   :  { %v2303_v41 = vpop.eup %2302  ;;  %v2164_v0 = vpack.c.bf16 %v2236_v39, %v2235_v40  ;;  %v2244_v43 = vpop.permute.xlu1 %2243 }
 0xba9   :  { %v2246_v44 = vunpack.i.h.bf16 %v2244_v43  ;;  %v2245_v45 = vunpack.i.l.bf16 %v2244_v43  ;;  %v1355_v46 = vmul.f32 %v2303_v41, %v2295_v20  ;;  %v2305_v5 = vpop.eup %2304 }
 0xbaa   :  { %2165 = vmatprep.subr.bf16.mxu1 %v2164_v0  ;;  %v2307_v1 = vpop.eup %2306  ;;  %v1352_v58 = vmul.f32 %v2305_v5, %v2672_v61 }
 0xbab   :  { %v2172_v60 = vpack.c.bf16 %v2246_v44, %v2245_v45  ;;  %2167 = vmatpush3.bf16.msra.mxu1 %v2164_v0  ;;  %2078 = vmatprep.mubr.msk.f32.mxu0 %vm70_vm0, %v1355_v46  ;;  %v2309_v55 = vpop.eup %2308  ;;  %v1354_v7 = vmul.f32 %v2307_v1, %v2677_v14 }
 0xbac   :  { %v2249_v49 = vpop.permute.xlu1 %2248  ;;  %2169 = vmatprep.subr.bf16.mxu1 %v2168_v52  ;;  %v2311_v56 = vpop.eup %2310  ;;  %v1353_v63 = vmul.f32 %v2309_v55, %v2681_v17 }
 0xbad   :  { %v2251_v51 = vunpack.i.h.bf16 %v2249_v49  ;;  %v2250_v54 = vunpack.i.l.bf16 %v2249_v49  ;;  %2173 = vmatprep.subr.bf16.mxu0 %v2172_v60  ;;  %v2313_v62 = vpop.eup %2312  ;;  %v1356_v4 = vmul.f32 %v2311_v56, %v2685_v19 }
 0xbae   :  { %2175 = vmatpush3.bf16.msra.mxu0 %v2172_v60  ;;  %v2315_v6 = vpop.eup %2314  ;;  %v1357_v8 = vmul.f32 %v2313_v62, %v2692_v24 }
 0xbaf   :  { %v2176_v57 = vpack.c.bf16 %v2251_v51, %v2250_v54  ;;  %2171 = vmatpush3.bf16.msra.mxu1 %v2168_v52  ;;  %v1358_v61 = vmul.f32 %v2315_v6, %v2690_v23 }
 0xbb0   :  { %2181 = vmatprep.subr.bf16.mxu1 %v2180_v50 }
 0xbb1   :  { %2177 = vmatprep.subr.bf16.mxu0 %v2176_v57 }
 0xbb2   :  { %2065 = vmatmul.mubr.msk.f32.vlgmr.msra.gmra.mrb[16].mxu1 %vm70_vm0, %v1352_v58  ;;  %2179 = vmatpush3.bf16.msra.mxu0 %v2176_v57 }
 0xbb3   :  { %2067 = vmatprep.mubr.msk.f32.mxu1 %vm70_vm0, %v1353_v63  ;;  %2183 = vmatpush3.bf16.msra.mxu1 %v2180_v50 }
 0xbb5   :  { %2079 = vmatmul.mubr.msk.f32.vlgmr.msra.gmra.mrb[16].mxu0 %vm70_vm0, %v1356_v4 }
 0xbb6   :  { %2068 = vmatmul.mubr.msk.f32.gmra.mrb[18].mxu1 %vm70_vm0, %v1354_v7  ;;  %2081 = vmatprep.mubr.msk.f32.mxu0 %vm70_vm0, %v1357_v8 }
 0xbb9   :  { %2082 = vmatmul.mubr.msk.f32.gmra.mrb[18].mxu0 %vm70_vm0, %v1358_v61 }
 0xc85   :  { %v2066_v10 = vpop.f32.mrb[16].mxu1 }
 0xc86   :  { %v1449_v11 = vpop.f32.mrb[17].mxu1 }
 0xc87   :  { %2088 = vmatprep.mubr.msk.f32.mxu1 %vm434_vm2, %v1449_v11 }
 0xc88   :  { %v2080_v12 = vpop.f32.mrb[16].mxu0  ;;  %2089 = vmatmul.mubr.msk.f32.vlgmr.msra.gmra.mrb[20].mxu1 %vm434_vm2, %v2066_v10 }
 0xc89   :  { %v2069_v13 = vpop.f32.mrb[18].mxu1  ;;  %v1558_v14 = vpop.f32.mrb[17].mxu0 }
 0xc8a   :  { %v1459_v15 = vpop.f32.mrb[19].mxu1 }
 0xc8b   :  { %2091 = vmatprep.mubr.msk.f32.mxu1 %vm434_vm2, %v1459_v15 }
 0xc8c   :  { %v2083_v16 = vpop.f32.mrb[18].mxu0  ;;  %2092 = vmatmul.mubr.msk.f32.gmra.mrb[22].mxu1 %vm434_vm2, %v2069_v13 }
 0xc8d   :  { %v1568_v17 = vpop.f32.mrb[19].mxu0  ;;  %2094 = vmatprep.mubr.msk.f32.mxu1 %vm434_vm2, %v1558_v14 }
 0xc90   :  { %2095 = vmatmul.mubr.msk.f32.gmra.mrb[24].mxu1 %vm434_vm2, %v2080_v12 }
 0xc91   :  { %2097 = vmatprep.mubr.msk.f32.mxu1 %vm434_vm2, %v1568_v17 }
 0xc94   :  { %2098 = vmatmul.mubr.msk.f32.gmra.mrb[26].mxu1 %vm434_vm2, %v2083_v16 }
 0xd5b   :  { %v2090_v19 = vpop.f32.mrb[20].mxu1 }
 0xd5c   :  { %v1676_v20 = vpop.f32.mrb[21].mxu1  ;;  %v1682_v24 = vadd.f32 %v2090_v19, %v1863_v18 }
 0xd5d   :  { %v1677_v21 = vadd.f32 %v1863_v18, %v1676_v20 }
 0xd5f   :  { %v2093_v22 = vpop.f32.mrb[22].mxu1  ;;  %1715 = vxpose.xlu0.b32.start [1/4] (short) (narrow) %v1677_v21, 16 }
 0xd60   :  { %v1686_v23 = vpop.f32.mrb[23].mxu1  ;;  %v1692_v31 = vadd.f32 %v2093_v22, %v1863_v18 }
 0xd61   :  { %v1687_v27 = vadd.f32 %v1863_v18, %v1686_v23 }
 0xd63   :  { %v2096_v25 = vpop.f32.mrb[24].mxu1  ;;  %1716 = vxpose.xlu0.b32.cont [2/4] (short) (narrow) %v1682_v24, 16 }
 0xd64   :  { %v1696_v26 = vpop.f32.mrb[25].mxu1  ;;  %v1702_v32 = vadd.f32 %v2096_v25, %v1863_v18 }
 0xd65   :  { %v1697_v28 = vadd.f32 %v1863_v18, %v1696_v26 }
 0xd67   :  { %v2099_v29 = vpop.f32.mrb[26].mxu1  ;;  %1747 = vxpose.xlu1.b32.start [1/4] (short) (narrow) %v1697_v28, 16  ;;  %1717 = vxpose.xlu0.b32.cont [3/4] (short) (narrow) %v1687_v27, 16 }
 0xd68   :  { %v1706_v30 = vpop.f32.mrb[27].mxu1  ;;  %v1712_v36 = vadd.f32 %v2099_v29, %v1863_v18 }
 0xd69   :  { %v1707_v33 = vadd.f32 %v1863_v18, %v1706_v30 }
 0xd6b   :  { %1748 = vxpose.xlu1.b32.cont [2/4] (short) (narrow) %v1702_v32, 16  ;;  %1718 = vxpose.xlu0.b32.end [4/4] (short) (narrow) %v1692_v31, 16 }
 0xd6f   :  { %1749 = vxpose.xlu1.b32.cont [3/4] (short) (narrow) %v1707_v33, 16 }
 0xd73   :  { %1750 = vxpose.xlu1.b32.end [4/4] (short) (narrow) %v1712_v36, 16 }
 0xddf   :  { %v1731_v59 = vpop.trf.xlu0 }
 0xde0   :  { %v1779_v3 = vadd.f32 %v1731_v59, %v2571_v35 }
 0xde2   :  { %1783 = vst.msk [vmem:[#allocation5] sm:$0xff] %vm70_vm0, %v1779_v3 }
 0xde3   :  { %v1732_v53 = vpop.trf.xlu0 }
 0xde4   :  { %v1780_v9 = vadd.f32 %v1732_v53, %v2568_v34 }
 0xde6   :  { %1784 = vst.msk [vmem:[#allocation5 + $0x8] sm:$0xff] %vm70_vm0, %v1780_v9 }
 0xde7   :  { %v1763_v37 = vpop.trf.xlu1 }
 0xde8   :  { %v1781_v38 = vadd.f32 %v1763_v37, %v2581_v2 }
 0xdea   :  { %1785 = vst.msk [vmem:[#allocation5 + $0x10] sm:$0xff] %vm70_vm0, %v1781_v38 }
 0xdeb   :  { %v1764_v39 = vpop.trf.xlu1 }
 0xdec   :  { %v1782_v40 = vadd.f32 %v1764_v39, %v2578_v42 }
 0xdee   :  { %1786 = vst.msk [vmem:[#allocation5 + $0x18] sm:$0xff] %vm70_vm0, %v1782_v40 }
 0xdef   :  { %2349 = shalt.err (!%p2346_p12)
}
 0xdf0   :  { %s2350_s30 = scalar_lea.hbm %s2774_s14, 512 }
 0xdf1   :  { %p2351_p13 = scmp.ne.s32.totalorder %s2774_s14, %s2350_s30  ;;  %p2354_p0 = scmp.lt.u32.totalorder %s2350_s30, %s2774_s14 }
 0xdf3   :  { %p2356_p1 = pnand %p2354_p0, %p2351_p13 }
 0xdf5   :  { %2359 = shalt.err (!%p2356_p1)
}
 0xdf6   :  { %1798 = dma.vmem_to_hbm [thread:$0]  %s1793_s0, 512, %s2774_s14, [#allocation4], %s2365_s23, %s2365_s23, %s2366_s24  }
 0xdf7   :  { %2362 = dma.done.wait [#allocation4], 512  }
 0xdf8   :  { %2363 = vsyncadd [#allocation4], 4294966784 }
 0xdf9   :  { %1802 = vsyncpa [#allocation3], 1 }
 0xdfa   :  { %1803 = vsyncpa [#allocation4], 1 }

</bundles_post_ra>
